<compile_context>
chip_gen: v6e
topology: v6e:2x2x1
jax: 0.10.0
libtpu: 0.0.40
codegen_flags: <defaults>
</compile_context>

<pallas_src>
import functools

import jax
import jax.numpy as jnp
from jax.experimental import pallas as pl
from jax.experimental.pallas import tpu as pltpu


_LANE = 128


def _round_up(x, m):
    return ((x + m - 1) // m) * m


def _spat_gnn_kernel(x_ref, wq_ref, bq_ref, wk_ref, bk_ref, wg_ref, bg_ref, out_ref,
                     *, bblk, seq_len, num_heads, hp):
    # x_ref:  (bblk*L, DP)        flattened, zero-padded batch rows
    # wq_ref: (DP, H*HP)          packed Q projection (scale folded in), zero-padded
    # bq_ref: (1, H*HP)
    # wk_ref: (DP, H*HP)          packed K projection, zero-padded
    # bk_ref: (1, H*HP)
    # wg_ref: (DP, DP)            W_gnn / num_heads, zero-padded
    # bg_ref: (1, DP)             B_gnn, zero-padded
    # out_ref:(bblk*L, DP)        x + relu(gnn(x)), padded lanes stay zero
    x = x_ref[...].astype(jnp.float32)

    # Dense, lane-aligned projections over the whole block of rows (one MXU pass each).
    q_all = jnp.dot(x, wq_ref[...], preferred_element_type=jnp.float32) + bq_ref[...]
    k_all = jnp.dot(x, wk_ref[...], preferred_element_type=jnp.float32) + bk_ref[...]
    # Hoisted GNN matmul: (attn @ x) @ W == attn @ (x @ W); overlaps with softmax below.
    xw = jnp.dot(x, wg_ref[...], preferred_element_type=jnp.float32)

    for bi in range(bblk):                       # static unroll over batch elements
        r0 = bi * seq_len
        attn_sum = jnp.zeros((seq_len, seq_len), jnp.float32)
        for h in range(num_heads):               # static unroll over heads
            c0 = h * hp                          # 128-aligned head slot
            q_h = q_all[r0:r0 + seq_len, c0:c0 + hp]
            k_h = k_all[r0:r0 + seq_len, c0:c0 + hp]
            # scores = (q * scale) @ k^T ; padded lanes are zero on both sides.
            s = jax.lax.dot_general(q_h, k_h, (((1,), (1,)), ((), ())),
                                    preferred_element_type=jnp.float32)
            s = s - jnp.max(s, axis=-1, keepdims=True)
            p = jnp.exp(s)
            attn_sum = attn_sum + p * pl.reciprocal(
                jnp.sum(p, axis=-1, keepdims=True), approx=True)
        # 1/num_heads is folded into wg_ref, so attn_sum is used unnormalized here.
        y = jnp.dot(attn_sum, xw[r0:r0 + seq_len, :],
                    preferred_element_type=jnp.float32) + bg_ref[...]
        y = jnp.maximum(y, 0.0)                  # relu (batch1 value is discarded)
        out_ref[r0:r0 + seq_len, :] = (x[r0:r0 + seq_len, :] + y).astype(out_ref.dtype)


def spatial_layer2_forward(x, wq, bq, wk, bk, w_gnn, b_gnn, *, num_heads=4,
                           batch_blocks=1):
    """x: (B, L, D). Returns x + relu(bmm(mean-head-attn, x) @ W_gnn + B_gnn).

    Parameters follow the `x @ W` convention (use `params_from_torch` to convert
    PyTorch nn.MultiheadAttention in_proj parameters).
    batch_blocks: 1 on v5e/v6e (single TensorCore); 2 on v7x to shard across cores.
    """
    b, l, d = x.shape
    assert d % num_heads == 0, "embed dim must be divisible by num_heads"
    assert b % batch_blocks == 0, "batch must divide evenly across batch_blocks"
    dh = d // num_heads
    dp = _round_up(d, _LANE)          # 100 -> 128 (lane-dense embed dim)
    hp = _round_up(dh, _LANE)         # 25  -> 128 (lane-aligned per-head slot)
    bblk = b // batch_blocks
    rows_per_step = bblk * l
    f32 = jnp.float32
    scale = 1.0 / (dh ** 0.5)

    # Pack per-head projections into (DP, H*HP): each head's dh valid columns sit at a
    # 128-aligned offset, everything else is zero (so Q.K^T over 128 lanes is exact).
    def pack(w, bias, s):
        w3 = (w.astype(f32) * s).reshape(d, num_heads, dh)
        b2 = (bias.astype(f32) * s).reshape(num_heads, dh)
        w3 = jnp.pad(w3, ((0, dp - d), (0, 0), (0, hp - dh)))
        b2 = jnp.pad(b2, ((0, 0), (0, hp - dh)))
        return w3.reshape(dp, num_heads * hp), b2.reshape(1, num_heads * hp)

    wq_p, bq_p = pack(wq, bq, scale)            # fold 1/sqrt(dh) into Q
    wk_p, bk_p = pack(wk, bk, 1.0)
    # Fold the 1/num_heads head-average into W_gnn (exact reassociation).
    wg_p = jnp.pad(w_gnn.astype(f32) * (1.0 / num_heads), ((0, dp - d), (0, dp - d)))
    bg_p = jnp.pad(b_gnn.astype(f32).reshape(1, d), ((0, 0), (0, dp - d)))

    # Flatten (B, L, D) -> (B*L, DP) with zero-padded lanes.
    x_flat = jnp.pad(x.reshape(b * l, d), ((0, 0), (0, dp - d)))

    kernel = functools.partial(_spat_gnn_kernel, bblk=bblk, seq_len=l,
                               num_heads=num_heads, hp=hp)

    cost = pl.CostEstimate(
        flops=(4 * b * l * dp * num_heads * hp      # packed Q/K projections
               + 2 * b * l * dp * dp                # x @ W_gnn
               + 2 * b * num_heads * l * l * hp     # per-head scores
               + 2 * b * l * l * dp),               # attn @ (x @ W_gnn)
        transcendentals=b * num_heads * l * (l + 1),
        bytes_accessed=4 * (2 * b * l * dp + wq_p.size + bq_p.size + wk_p.size
                            + bk_p.size + wg_p.size + bg_p.size),
    )

    const2 = lambda i: (0, 0)   # constant index_map: weights stay VMEM-resident, no re-DMA
    out = pl.pallas_call(
        kernel,
        out_shape=jax.ShapeDtypeStruct((b * l, dp), x.dtype),
        grid=(batch_blocks,),
        in_specs=[
            pl.BlockSpec((rows_per_step, dp), lambda i: (i, 0)),   # x rows for this step
            pl.BlockSpec((dp, num_heads * hp), const2),
            pl.BlockSpec((1, num_heads * hp), const2),
            pl.BlockSpec((dp, num_heads * hp), const2),
            pl.BlockSpec((1, num_heads * hp), const2),
            pl.BlockSpec((dp, dp), const2),
            pl.BlockSpec((1, dp), const2),
        ],
        out_specs=pl.BlockSpec((rows_per_step, dp), lambda i: (i, 0)),
        compiler_params=pltpu.CompilerParams(
            dimension_semantics=("parallel",)),   # batch-block axis -> megacore on v7x
        cost_estimate=cost,
    )(x_flat, wq_p, bq_p, wk_p, bk_p, wg_p, bg_p)

    # Slice the zero-padded lanes back off and restore (B, L, D).
    return out[:, :d].reshape(b, l, d)


def params_from_torch(in_proj_weight, in_proj_bias, w_gnn, b_gnn, *, d_model=100):
    """Convert PyTorch-convention parameters to the `x @ W` convention used here.

    nn.MultiheadAttention.in_proj_weight is a stacked [Wq; Wk; Wv] of shape (3D, D) in
    torch Linear's (out, in) layout -> split and transpose. GNN.W_gnn / B_gnn are raw
    Parameters applied as torch.matmul(x, W_gnn) + B_gnn, so they pass through as-is.
    """
    wq_t = in_proj_weight[:d_model]
    wk_t = in_proj_weight[d_model:2 * d_model]
    return dict(
        wq=wq_t.T, bq=in_proj_bias[:d_model],
        wk=wk_t.T, bk=in_proj_bias[d_model:2 * d_model],
        w_gnn=w_gnn, b_gnn=b_gnn,
    )


def da_gnn_invariance_ver3_forward(x, labels, params, *, num_heads=4, d_model=100,
                                   batch_blocks=1):
    """Pallas forward for the part of DA_gnn_invariance_ver3 the module computes itself.

    Returns x2 = Spatial_layer2(x, labels), the tensor the PyTorch code feeds into
    `basic_model`. The head-averaged attention `b` only feeds a host-side python dict
    (attention_storage) in PyTorch, so it is not materialized here.
    """
    if x.shape[2] != d_model:
        x = jnp.transpose(x, (0, 2, 1))
    x2 = spatial_layer2_forward(
        x, params["wq"], params["bq"], params["wk"], params["bk"],
        params["w_gnn"], params["b_gnn"], num_heads=num_heads,
        batch_blocks=batch_blocks)
    del labels  # labels only feed the attention_storage python-dict side effect.
    # em_da = normalize_tensor_batch(x2) is computed in PyTorch but never used.
    # MLP1/2/3 and the Dropout2d layers are never invoked in forward().
    # TODO(synk): basic_model is an externally-injected nn.Module (not defined in the
    # spec); its calls producing (z_s1, z_t2, pred) cannot be translated here.
    return x2


def _reference_forward(x, wq, bq, wk, bk, w_gnn, b_gnn, num_heads):
    """Pure-JAX reference: MHA attention weights + bmm + W_gnn + relu + residual."""
    b, l, d = x.shape
    dh = d // num_heads
    q = x @ wq + bq
    k = x @ wk + bk
    qh = q.reshape(b, l, num_heads, dh).transpose(0, 2, 1, 3)
    kh = k.reshape(b, l, num_heads, dh).transpose(0, 2, 1, 3)
    s = jnp.einsum("bhld,bhmd->bhlm", qh, kh) / (dh ** 0.5)
    attn = jax.nn.softmax(s, axis=-1).mean(axis=1)
    y = jnp.einsum("blm,bmd->bld", attn, x) @ w_gnn + b_gnn
    return x + jnp.maximum(y, 0.0)


if __name__ == "__main__":
    key = jax.random.PRNGKey(0)
    # batch=2, electrodes (MHA seq len)=8, embed dim=100 (hard-coded by the module), 4 heads
    B, L, D, H = 2, 8, 100, 4
    ks = jax.random.split(key, 5)
    x = jax.random.normal(ks[0], (B, L, D), dtype=jnp.float32)
    # Build parameters in the PyTorch layout and convert explicitly (documents the
    # in_proj_weight = [Wq;Wk;Wv], (out,in)-transposed convention).
    in_proj_weight = 0.1 * jax.random.normal(ks[1], (3 * D, D), dtype=jnp.float32)
    in_proj_bias = 0.1 * jax.random.normal(ks[2], (3 * D,), dtype=jnp.float32)
    w_gnn = 0.1 * jax.random.normal(ks[3], (D, D), dtype=jnp.float32)
    b_gnn = 0.1 * jax.random.normal(ks[4], (D,), dtype=jnp.float32)
    params = params_from_torch(in_proj_weight, in_proj_bias, w_gnn, b_gnn, d_model=D)
    labels = jnp.array([0, 1], dtype=jnp.int32)  # only used for storage side-effects in torch

    x2 = da_gnn_invariance_ver3_forward(x, labels, params, num_heads=H, d_model=D,
                                        batch_blocks=1)
    x2 = jax.block_until_ready(x2)

    x2_ref = _reference_forward(x, params["wq"], params["bq"], params["wk"],
                                params["bk"], params["w_gnn"], params["b_gnn"], H)

    assert x2.shape == (B, L, D) and x2.dtype == x.dtype, (x2.shape, x2.dtype)
    max_err = float(jnp.abs(x2 - x2_ref).max())
    # Tolerance accounts for the EUP approx-reciprocal in the softmax normalization.
    assert max_err < 2e-3, max_err

    print("KERNEL_OK")
</pallas_src>

<mosaic_0001>
module attributes {stable_mosaic.version = 11 : i64} {
  func.func @_spat_gnn_kernel(%arg0: i32, %arg1: memref<16x128xf32, #tpu.memory_space<vmem>>, %arg2: memref<128x512xf32, #tpu.memory_space<vmem>>, %arg3: memref<1x512xf32, #tpu.memory_space<vmem>>, %arg4: memref<128x512xf32, #tpu.memory_space<vmem>>, %arg5: memref<1x512xf32, #tpu.memory_space<vmem>>, %arg6: memref<128x128xf32, #tpu.memory_space<vmem>>, %arg7: memref<1x128xf32, #tpu.memory_space<vmem>>, %arg8: memref<16x128xf32, #tpu.memory_space<vmem>>) attributes {dimension_semantics = [#tpu.dimension_semantics<parallel>], iteration_bounds = array<i64: 1>, scalar_prefetch = 0 : i64, scratch_operands = 0 : i64, tpu.core_type = #tpu.core_type<tc>, window_params = [{transform_indices = @transform_0, window_bounds = array<i64: 16, 128>}, {pipeline_mode = #tpu.pipeline_mode<synchronous>, transform_indices = @transform_1, window_bounds = array<i64: 128, 512>}, {pipeline_mode = #tpu.pipeline_mode<synchronous>, transform_indices = @transform_2, window_bounds = array<i64: 1, 512>}, {pipeline_mode = #tpu.pipeline_mode<synchronous>, transform_indices = @transform_3, window_bounds = array<i64: 128, 512>}, {pipeline_mode = #tpu.pipeline_mode<synchronous>, transform_indices = @transform_4, window_bounds = array<i64: 1, 512>}, {pipeline_mode = #tpu.pipeline_mode<synchronous>, transform_indices = @transform_5, window_bounds = array<i64: 128, 128>}, {pipeline_mode = #tpu.pipeline_mode<synchronous>, transform_indices = @transform_6, window_bounds = array<i64: 1, 128>}, {transform_indices = @transform_7, window_bounds = array<i64: 16, 128>}]} {
    %c0 = arith.constant 0 : index
    %c0_0 = arith.constant 0 : index
    %0 = vector.load %arg1[%c0, %c0_0] : memref<16x128xf32, #tpu.memory_space<vmem>>, vector<16x128xf32>
    %c0_1 = arith.constant 0 : index
    %c0_2 = arith.constant 0 : index
    %1 = vector.load %arg2[%c0_1, %c0_2] : memref<128x512xf32, #tpu.memory_space<vmem>>, vector<128x512xf32>
    %cst = arith.constant dense<0.000000e+00> : vector<16x512xf32>
    %2 = tpu.matmul %0, %1, %cst {dimension_numbers = #tpu.dot_dimension_numbers<[1], [0], [0], [1], [0, 0, 1, 1], [], []>} : vector<16x128xf32>, vector<128x512xf32>, vector<16x512xf32> -> vector<16x512xf32>
    %c0_3 = arith.constant 0 : index
    %c0_4 = arith.constant 0 : index
    %3 = vector.load %arg3[%c0_3, %c0_4] : memref<1x512xf32, #tpu.memory_space<vmem>>, vector<1x512xf32>
    %4 = vector.broadcast %3 : vector<1x512xf32> to vector<16x512xf32>
    %5 = arith.addf %2, %4 : vector<16x512xf32>
    %c0_5 = arith.constant 0 : index
    %c0_6 = arith.constant 0 : index
    %6 = vector.load %arg4[%c0_5, %c0_6] : memref<128x512xf32, #tpu.memory_space<vmem>>, vector<128x512xf32>
    %cst_7 = arith.constant dense<0.000000e+00> : vector<16x512xf32>
    %7 = tpu.matmul %0, %6, %cst_7 {dimension_numbers = #tpu.dot_dimension_numbers<[1], [0], [0], [1], [0, 0, 1, 1], [], []>} : vector<16x128xf32>, vector<128x512xf32>, vector<16x512xf32> -> vector<16x512xf32>
    %c0_8 = arith.constant 0 : index
    %c0_9 = arith.constant 0 : index
    %8 = vector.load %arg5[%c0_8, %c0_9] : memref<1x512xf32, #tpu.memory_space<vmem>>, vector<1x512xf32>
    %9 = vector.broadcast %8 : vector<1x512xf32> to vector<16x512xf32>
    %10 = arith.addf %7, %9 : vector<16x512xf32>
    %c0_10 = arith.constant 0 : index
    %c0_11 = arith.constant 0 : index
    %11 = vector.load %arg6[%c0_10, %c0_11] : memref<128x128xf32, #tpu.memory_space<vmem>>, vector<128x128xf32>
    %cst_12 = arith.constant dense<0.000000e+00> : vector<16x128xf32>
    %12 = tpu.matmul %0, %11, %cst_12 {dimension_numbers = #tpu.dot_dimension_numbers<[1], [0], [0], [1], [0, 0, 1, 1], [], []>} : vector<16x128xf32>, vector<128x128xf32>, vector<16x128xf32> -> vector<16x128xf32>
    %cst_13 = arith.constant 0.000000e+00 : f32
    %13 = vector.broadcast %cst_13 : f32 to vector<8x8xf32>
    %14 = vector.extract_strided_slice %5 {offsets = [0, 0], sizes = [8, 128], strides = [1, 1]} : vector<16x512xf32> to vector<8x128xf32>
    %15 = vector.extract_strided_slice %10 {offsets = [0, 0], sizes = [8, 128], strides = [1, 1]} : vector<16x512xf32> to vector<8x128xf32>
    %cst_14 = arith.constant dense<0.000000e+00> : vector<8x8xf32>
    %16 = tpu.matmul %14, %15, %cst_14 {dimension_numbers = #tpu.dot_dimension_numbers<[1], [1], [0], [0], [0, 0, 1, 0], [], []>} : vector<8x128xf32>, vector<8x128xf32>, vector<8x8xf32> -> vector<8x8xf32>
    %cst_15 = arith.constant dense<0xFF800000> : vector<8xf32>
    %17 = vector.multi_reduction <maximumf>, %16, %cst_15 [1] : vector<8x8xf32> to vector<8xf32>
    %18 = vector.shape_cast %17 : vector<8xf32> to vector<8x1xf32>
    %19 = vector.broadcast %18 : vector<8x1xf32> to vector<8x8xf32>
    %20 = arith.subf %16, %19 : vector<8x8xf32>
    %21 = math.exp %20 : vector<8x8xf32>
    %cst_16 = arith.constant dense<0.000000e+00> : vector<8xf32>
    %22 = vector.multi_reduction <add>, %21, %cst_16 [1] : vector<8x8xf32> to vector<8xf32>
    %23 = vector.shape_cast %22 : vector<8xf32> to vector<8x1xf32>
    %24 = tpu.reciprocal %23 {approx = true} : vector<8x1xf32> -> vector<8x1xf32>
    %25 = vector.broadcast %24 : vector<8x1xf32> to vector<8x8xf32>
    %26 = arith.mulf %21, %25 : vector<8x8xf32>
    %27 = arith.addf %13, %26 : vector<8x8xf32>
    %28 = vector.extract_strided_slice %5 {offsets = [0, 128], sizes = [8, 128], strides = [1, 1]} : vector<16x512xf32> to vector<8x128xf32>
    %29 = vector.extract_strided_slice %10 {offsets = [0, 128], sizes = [8, 128], strides = [1, 1]} : vector<16x512xf32> to vector<8x128xf32>
    %cst_17 = arith.constant dense<0.000000e+00> : vector<8x8xf32>
    %30 = tpu.matmul %28, %29, %cst_17 {dimension_numbers = #tpu.dot_dimension_numbers<[1], [1], [0], [0], [0, 0, 1, 0], [], []>} : vector<8x128xf32>, vector<8x128xf32>, vector<8x8xf32> -> vector<8x8xf32>
    %cst_18 = arith.constant dense<0xFF800000> : vector<8xf32>
    %31 = vector.multi_reduction <maximumf>, %30, %cst_18 [1] : vector<8x8xf32> to vector<8xf32>
    %32 = vector.shape_cast %31 : vector<8xf32> to vector<8x1xf32>
    %33 = vector.broadcast %32 : vector<8x1xf32> to vector<8x8xf32>
    %34 = arith.subf %30, %33 : vector<8x8xf32>
    %35 = math.exp %34 : vector<8x8xf32>
    %cst_19 = arith.constant dense<0.000000e+00> : vector<8xf32>
    %36 = vector.multi_reduction <add>, %35, %cst_19 [1] : vector<8x8xf32> to vector<8xf32>
    %37 = vector.shape_cast %36 : vector<8xf32> to vector<8x1xf32>
    %38 = tpu.reciprocal %37 {approx = true} : vector<8x1xf32> -> vector<8x1xf32>
    %39 = vector.broadcast %38 : vector<8x1xf32> to vector<8x8xf32>
    %40 = arith.mulf %35, %39 : vector<8x8xf32>
    %41 = arith.addf %27, %40 : vector<8x8xf32>
    %42 = vector.extract_strided_slice %5 {offsets = [0, 256], sizes = [8, 128], strides = [1, 1]} : vector<16x512xf32> to vector<8x128xf32>
    %43 = vector.extract_strided_slice %10 {offsets = [0, 256], sizes = [8, 128], strides = [1, 1]} : vector<16x512xf32> to vector<8x128xf32>
    %cst_20 = arith.constant dense<0.000000e+00> : vector<8x8xf32>
    %44 = tpu.matmul %42, %43, %cst_20 {dimension_numbers = #tpu.dot_dimension_numbers<[1], [1], [0], [0], [0, 0, 1, 0], [], []>} : vector<8x128xf32>, vector<8x128xf32>, vector<8x8xf32> -> vector<8x8xf32>
    %cst_21 = arith.constant dense<0xFF800000> : vector<8xf32>
    %45 = vector.multi_reduction <maximumf>, %44, %cst_21 [1] : vector<8x8xf32> to vector<8xf32>
    %46 = vector.shape_cast %45 : vector<8xf32> to vector<8x1xf32>
    %47 = vector.broadcast %46 : vector<8x1xf32> to vector<8x8xf32>
    %48 = arith.subf %44, %47 : vector<8x8xf32>
    %49 = math.exp %48 : vector<8x8xf32>
    %cst_22 = arith.constant dense<0.000000e+00> : vector<8xf32>
    %50 = vector.multi_reduction <add>, %49, %cst_22 [1] : vector<8x8xf32> to vector<8xf32>
    %51 = vector.shape_cast %50 : vector<8xf32> to vector<8x1xf32>
    %52 = tpu.reciprocal %51 {approx = true} : vector<8x1xf32> -> vector<8x1xf32>
    %53 = vector.broadcast %52 : vector<8x1xf32> to vector<8x8xf32>
    %54 = arith.mulf %49, %53 : vector<8x8xf32>
    %55 = arith.addf %41, %54 : vector<8x8xf32>
    %56 = vector.extract_strided_slice %5 {offsets = [0, 384], sizes = [8, 128], strides = [1, 1]} : vector<16x512xf32> to vector<8x128xf32>
    %57 = vector.extract_strided_slice %10 {offsets = [0, 384], sizes = [8, 128], strides = [1, 1]} : vector<16x512xf32> to vector<8x128xf32>
    %cst_23 = arith.constant dense<0.000000e+00> : vector<8x8xf32>
    %58 = tpu.matmul %56, %57, %cst_23 {dimension_numbers = #tpu.dot_dimension_numbers<[1], [1], [0], [0], [0, 0, 1, 0], [], []>} : vector<8x128xf32>, vector<8x128xf32>, vector<8x8xf32> -> vector<8x8xf32>
    %cst_24 = arith.constant dense<0xFF800000> : vector<8xf32>
    %59 = vector.multi_reduction <maximumf>, %58, %cst_24 [1] : vector<8x8xf32> to vector<8xf32>
    %60 = vector.shape_cast %59 : vector<8xf32> to vector<8x1xf32>
    %61 = vector.broadcast %60 : vector<8x1xf32> to vector<8x8xf32>
    %62 = arith.subf %58, %61 : vector<8x8xf32>
    %63 = math.exp %62 : vector<8x8xf32>
    %cst_25 = arith.constant dense<0.000000e+00> : vector<8xf32>
    %64 = vector.multi_reduction <add>, %63, %cst_25 [1] : vector<8x8xf32> to vector<8xf32>
    %65 = vector.shape_cast %64 : vector<8xf32> to vector<8x1xf32>
    %66 = tpu.reciprocal %65 {approx = true} : vector<8x1xf32> -> vector<8x1xf32>
    %67 = vector.broadcast %66 : vector<8x1xf32> to vector<8x8xf32>
    %68 = arith.mulf %63, %67 : vector<8x8xf32>
    %69 = arith.addf %55, %68 : vector<8x8xf32>
    %70 = vector.extract_strided_slice %12 {offsets = [0, 0], sizes = [8, 128], strides = [1, 1]} : vector<16x128xf32> to vector<8x128xf32>
    %cst_26 = arith.constant dense<0.000000e+00> : vector<8x128xf32>
    %71 = tpu.matmul %69, %70, %cst_26 {dimension_numbers = #tpu.dot_dimension_numbers<[1], [0], [0], [1], [0, 0, 1, 1], [], []>} : vector<8x8xf32>, vector<8x128xf32>, vector<8x128xf32> -> vector<8x128xf32>
    %c0_27 = arith.constant 0 : index
    %c0_28 = arith.constant 0 : index
    %72 = vector.load %arg7[%c0_27, %c0_28] : memref<1x128xf32, #tpu.memory_space<vmem>>, vector<1x128xf32>
    %73 = vector.broadcast %72 : vector<1x128xf32> to vector<8x128xf32>
    %74 = arith.addf %71, %73 : vector<8x128xf32>
    %cst_29 = arith.constant 0.000000e+00 : f32
    %75 = vector.broadcast %cst_29 : f32 to vector<8x128xf32>
    %76 = arith.maximumf %74, %75 : vector<8x128xf32>
    %77 = vector.extract_strided_slice %0 {offsets = [0, 0], sizes = [8, 128], strides = [1, 1]} : vector<16x128xf32> to vector<8x128xf32>
    %78 = arith.addf %77, %76 : vector<8x128xf32>
    %c0_30 = arith.constant 0 : index
    %c0_31 = arith.constant 0 : index
    %79 = vector.load %arg8[%c0_30, %c0_31] : memref<16x128xf32, #tpu.memory_space<vmem>>, vector<8x128xf32>
    tpu.vector_store %arg8[%c0_30, %c0_31], %78 {strides = array<i32>} : memref<16x128xf32, #tpu.memory_space<vmem>>, vector<8x128xf32>,
    %cst_32 = arith.constant 0.000000e+00 : f32
    %80 = vector.broadcast %cst_32 : f32 to vector<8x8xf32>
    %81 = vector.extract_strided_slice %5 {offsets = [8, 0], sizes = [8, 128], strides = [1, 1]} : vector<16x512xf32> to vector<8x128xf32>
    %82 = vector.extract_strided_slice %10 {offsets = [8, 0], sizes = [8, 128], strides = [1, 1]} : vector<16x512xf32> to vector<8x128xf32>
    %cst_33 = arith.constant dense<0.000000e+00> : vector<8x8xf32>
    %83 = tpu.matmul %81, %82, %cst_33 {dimension_numbers = #tpu.dot_dimension_numbers<[1], [1], [0], [0], [0, 0, 1, 0], [], []>} : vector<8x128xf32>, vector<8x128xf32>, vector<8x8xf32> -> vector<8x8xf32>
    %cst_34 = arith.constant dense<0xFF800000> : vector<8xf32>
    %84 = vector.multi_reduction <maximumf>, %83, %cst_34 [1] : vector<8x8xf32> to vector<8xf32>
    %85 = vector.shape_cast %84 : vector<8xf32> to vector<8x1xf32>
    %86 = vector.broadcast %85 : vector<8x1xf32> to vector<8x8xf32>
    %87 = arith.subf %83, %86 : vector<8x8xf32>
    %88 = math.exp %87 : vector<8x8xf32>
    %cst_35 = arith.constant dense<0.000000e+00> : vector<8xf32>
    %89 = vector.multi_reduction <add>, %88, %cst_35 [1] : vector<8x8xf32> to vector<8xf32>
    %90 = vector.shape_cast %89 : vector<8xf32> to vector<8x1xf32>
    %91 = tpu.reciprocal %90 {approx = true} : vector<8x1xf32> -> vector<8x1xf32>
    %92 = vector.broadcast %91 : vector<8x1xf32> to vector<8x8xf32>
    %93 = arith.mulf %88, %92 : vector<8x8xf32>
    %94 = arith.addf %80, %93 : vector<8x8xf32>
    %95 = vector.extract_strided_slice %5 {offsets = [8, 128], sizes = [8, 128], strides = [1, 1]} : vector<16x512xf32> to vector<8x128xf32>
    %96 = vector.extract_strided_slice %10 {offsets = [8, 128], sizes = [8, 128], strides = [1, 1]} : vector<16x512xf32> to vector<8x128xf32>
    %cst_36 = arith.constant dense<0.000000e+00> : vector<8x8xf32>
    %97 = tpu.matmul %95, %96, %cst_36 {dimension_numbers = #tpu.dot_dimension_numbers<[1], [1], [0], [0], [0, 0, 1, 0], [], []>} : vector<8x128xf32>, vector<8x128xf32>, vector<8x8xf32> -> vector<8x8xf32>
    %cst_37 = arith.constant dense<0xFF800000> : vector<8xf32>
    %98 = vector.multi_reduction <maximumf>, %97, %cst_37 [1] : vector<8x8xf32> to vector<8xf32>
    %99 = vector.shape_cast %98 : vector<8xf32> to vector<8x1xf32>
    %100 = vector.broadcast %99 : vector<8x1xf32> to vector<8x8xf32>
    %101 = arith.subf %97, %100 : vector<8x8xf32>
    %102 = math.exp %101 : vector<8x8xf32>
    %cst_38 = arith.constant dense<0.000000e+00> : vector<8xf32>
    %103 = vector.multi_reduction <add>, %102, %cst_38 [1] : vector<8x8xf32> to vector<8xf32>
    %104 = vector.shape_cast %103 : vector<8xf32> to vector<8x1xf32>
    %105 = tpu.reciprocal %104 {approx = true} : vector<8x1xf32> -> vector<8x1xf32>
    %106 = vector.broadcast %105 : vector<8x1xf32> to vector<8x8xf32>
    %107 = arith.mulf %102, %106 : vector<8x8xf32>
    %108 = arith.addf %94, %107 : vector<8x8xf32>
    %109 = vector.extract_strided_slice %5 {offsets = [8, 256], sizes = [8, 128], strides = [1, 1]} : vector<16x512xf32> to vector<8x128xf32>
    %110 = vector.extract_strided_slice %10 {offsets = [8, 256], sizes = [8, 128], strides = [1, 1]} : vector<16x512xf32> to vector<8x128xf32>
    %cst_39 = arith.constant dense<0.000000e+00> : vector<8x8xf32>
    %111 = tpu.matmul %109, %110, %cst_39 {dimension_numbers = #tpu.dot_dimension_numbers<[1], [1], [0], [0], [0, 0, 1, 0], [], []>} : vector<8x128xf32>, vector<8x128xf32>, vector<8x8xf32> -> vector<8x8xf32>
    %cst_40 = arith.constant dense<0xFF800000> : vector<8xf32>
    %112 = vector.multi_reduction <maximumf>, %111, %cst_40 [1] : vector<8x8xf32> to vector<8xf32>
    %113 = vector.shape_cast %112 : vector<8xf32> to vector<8x1xf32>
    %114 = vector.broadcast %113 : vector<8x1xf32> to vector<8x8xf32>
    %115 = arith.subf %111, %114 : vector<8x8xf32>
    %116 = math.exp %115 : vector<8x8xf32>
    %cst_41 = arith.constant dense<0.000000e+00> : vector<8xf32>
    %117 = vector.multi_reduction <add>, %116, %cst_41 [1] : vector<8x8xf32> to vector<8xf32>
    %118 = vector.shape_cast %117 : vector<8xf32> to vector<8x1xf32>
    %119 = tpu.reciprocal %118 {approx = true} : vector<8x1xf32> -> vector<8x1xf32>
    %120 = vector.broadcast %119 : vector<8x1xf32> to vector<8x8xf32>
    %121 = arith.mulf %116, %120 : vector<8x8xf32>
    %122 = arith.addf %108, %121 : vector<8x8xf32>
    %123 = vector.extract_strided_slice %5 {offsets = [8, 384], sizes = [8, 128], strides = [1, 1]} : vector<16x512xf32> to vector<8x128xf32>
    %124 = vector.extract_strided_slice %10 {offsets = [8, 384], sizes = [8, 128], strides = [1, 1]} : vector<16x512xf32> to vector<8x128xf32>
    %cst_42 = arith.constant dense<0.000000e+00> : vector<8x8xf32>
    %125 = tpu.matmul %123, %124, %cst_42 {dimension_numbers = #tpu.dot_dimension_numbers<[1], [1], [0], [0], [0, 0, 1, 0], [], []>} : vector<8x128xf32>, vector<8x128xf32>, vector<8x8xf32> -> vector<8x8xf32>
    %cst_43 = arith.constant dense<0xFF800000> : vector<8xf32>
    %126 = vector.multi_reduction <maximumf>, %125, %cst_43 [1] : vector<8x8xf32> to vector<8xf32>
    %127 = vector.shape_cast %126 : vector<8xf32> to vector<8x1xf32>
    %128 = vector.broadcast %127 : vector<8x1xf32> to vector<8x8xf32>
    %129 = arith.subf %125, %128 : vector<8x8xf32>
    %130 = math.exp %129 : vector<8x8xf32>
    %cst_44 = arith.constant dense<0.000000e+00> : vector<8xf32>
    %131 = vector.multi_reduction <add>, %130, %cst_44 [1] : vector<8x8xf32> to vector<8xf32>
    %132 = vector.shape_cast %131 : vector<8xf32> to vector<8x1xf32>
    %133 = tpu.reciprocal %132 {approx = true} : vector<8x1xf32> -> vector<8x1xf32>
    %134 = vector.broadcast %133 : vector<8x1xf32> to vector<8x8xf32>
    %135 = arith.mulf %130, %134 : vector<8x8xf32>
    %136 = arith.addf %122, %135 : vector<8x8xf32>
    %137 = vector.extract_strided_slice %12 {offsets = [8, 0], sizes = [8, 128], strides = [1, 1]} : vector<16x128xf32> to vector<8x128xf32>
    %cst_45 = arith.constant dense<0.000000e+00> : vector<8x128xf32>
    %138 = tpu.matmul %136, %137, %cst_45 {dimension_numbers = #tpu.dot_dimension_numbers<[1], [0], [0], [1], [0, 0, 1, 1], [], []>} : vector<8x8xf32>, vector<8x128xf32>, vector<8x128xf32> -> vector<8x128xf32>
    %c0_46 = arith.constant 0 : index
    %c0_47 = arith.constant 0 : index
    %139 = vector.load %arg7[%c0_46, %c0_47] : memref<1x128xf32, #tpu.memory_space<vmem>>, vector<1x128xf32>
    %140 = vector.broadcast %139 : vector<1x128xf32> to vector<8x128xf32>
    %141 = arith.addf %138, %140 : vector<8x128xf32>
    %cst_48 = arith.constant 0.000000e+00 : f32
    %142 = vector.broadcast %cst_48 : f32 to vector<8x128xf32>
    %143 = arith.maximumf %141, %142 : vector<8x128xf32>
    %144 = vector.extract_strided_slice %0 {offsets = [8, 0], sizes = [8, 128], strides = [1, 1]} : vector<16x128xf32> to vector<8x128xf32>
    %145 = arith.addf %144, %143 : vector<8x128xf32>
    %c8 = arith.constant 8 : index
    %c0_49 = arith.constant 0 : index
    %146 = vector.load %arg8[%c8, %c0_49] : memref<16x128xf32, #tpu.memory_space<vmem>>, vector<8x128xf32>
    tpu.vector_store %arg8[%c8, %c0_49], %145 {strides = array<i32>} : memref<16x128xf32, #tpu.memory_space<vmem>>, vector<8x128xf32>,
    return
  }
  func.func @transform_0(%arg0: i32) -> (i32, i32) {
    %c0_i32 = arith.constant 0 : i32
    %c0_i32_0 = arith.constant 0 : i32
    return %arg0, %c0_i32 : i32, i32
  }
  func.func @transform_1(%arg0: i32) -> (i32, i32) {
    %c0_i32 = arith.constant 0 : i32
    %c0_i32_0 = arith.constant 0 : i32
    %c0_i32_1 = arith.constant 0 : i32
    return %c0_i32, %c0_i32_0 : i32, i32
  }
  func.func @transform_2(%arg0: i32) -> (i32, i32) {
    %c0_i32 = arith.constant 0 : i32
    %c0_i32_0 = arith.constant 0 : i32
    %c0_i32_1 = arith.constant 0 : i32
    return %c0_i32, %c0_i32_0 : i32, i32
  }
  func.func @transform_3(%arg0: i32) -> (i32, i32) {
    %c0_i32 = arith.constant 0 : i32
    %c0_i32_0 = arith.constant 0 : i32
    %c0_i32_1 = arith.constant 0 : i32
    return %c0_i32, %c0_i32_0 : i32, i32
  }
  func.func @transform_4(%arg0: i32) -> (i32, i32) {
    %c0_i32 = arith.constant 0 : i32
    %c0_i32_0 = arith.constant 0 : i32
    %c0_i32_1 = arith.constant 0 : i32
    return %c0_i32, %c0_i32_0 : i32, i32
  }
  func.func @transform_5(%arg0: i32) -> (i32, i32) {
    %c0_i32 = arith.constant 0 : i32
    %c0_i32_0 = arith.constant 0 : i32
    %c0_i32_1 = arith.constant 0 : i32
    return %c0_i32, %c0_i32_0 : i32, i32
  }
  func.func @transform_6(%arg0: i32) -> (i32, i32) {
    %c0_i32 = arith.constant 0 : i32
    %c0_i32_0 = arith.constant 0 : i32
    %c0_i32_1 = arith.constant 0 : i32
    return %c0_i32, %c0_i32_0 : i32, i32
  }
  func.func @transform_7(%arg0: i32) -> (i32, i32) {
    %c0_i32 = arith.constant 0 : i32
    %c0_i32_0 = arith.constant 0 : i32
    return %arg0, %c0_i32 : i32, i32
  }
}

</mosaic_0001>

<bundles_post_ra>
// kernel: tpu_custom_call.1
= control target key start
LH: loop header
LB: loop body
LE: loop exit
PB: predicated region body
PF: predicated region fallthrough
CT: control target
= control target key end

     0   :  { %12 = vsyncpa [#allocation3], 0  ;;  %s1994_s0 = inlined_call_operand.hbm [shape: f32[16,128], index: 0, kind: input, shape index: {}]   ;;  %s1995_s1 = inlined_call_operand.hbm [shape: f32[128,512], index: 1, kind: input, shape index: {}]   ;;  %s1996_s2 = inlined_call_operand.hbm [shape: f32[1,512], index: 2, kind: input, shape index: {}]   ;;  %s1997_s3 = inlined_call_operand.hbm [shape: f32[128,512], index: 3, kind: input, shape index: {}]   ;;  %s1998_s4 = inlined_call_operand.vmem [shape: f32[1,512], index: 4, kind: input, shape index: {}]   ;;  %s1999_s5 = inlined_call_operand.hbm [shape: f32[128,128], index: 5, kind: input, shape index: {}]   ;;  %s2000_s6 = inlined_call_operand.vmem [shape: f32[1,128], index: 6, kind: input, shape index: {}]   ;;  %s2001_s7 = inlined_call_operand.hbm [shape: f32[16,128], index: 7, kind: output, shape index: {}]  }
   0x1   :  { %13 = vsyncpa [#allocation6], 0 }
   0x2   :  { %14 = vsyncpa [#allocation9], 0 }
   0x3   :  { %15 = vsyncpa [#allocation4], 0  ;;  %s1807_s24 = smov [#allocation5]  }
   0x4   :  { %s33_s25 = sshll.u32 %s1807_s24, 4  ;;  %s34_s25 = int_to_ptr.vmem [resolvable:$true] %s33_s25 }
   0x5   :  { %s1687_s26 = scalar_lea.vmem %s34_s25, 8192  ;;  %p1692_p1 = scmp.lt.s32.totalorder %s34_s25, %s34_s25 }
   0x6   :  { %p1688_p0 = scmp.ne.s32.totalorder %s34_s25, %s1687_s26  ;;  %p1693_p2 = scmp.lt.s32.totalorder %s1687_s26, %s1687_s26 }
   0x8   :  { %p1694_p3 = por %p1693_p2, %p1692_p1 }
   0xa   :  { %p1695_p4 = pnand %p1694_p3, %p1688_p0 }
   0xc   :  { %1698 = shalt.err (!%p1695_p4)
}
   0xd   :  { %s1808_s27 = smov 512   ;;  %s1809_s28 = smov 32  }
   0xe   :  { %39 = dma.hbm_to_vmem [thread:$0]  %s1995_s1, 8192, %s34_s25, [#allocation6], %s1808_s27, %s1808_s27, %s1809_s28  }
   0xf   :  { %s1810_s8 = smov [#allocation8]   ;;  %s1811_s10 = smov [#allocation2]  }
  0x10   :  { %s55_s9 = sshll.u32 %s1810_s8, 4  ;;  %s21_s11 = sshll.u32 %s1811_s10, 4  ;;  %s56_s9 = int_to_ptr.vmem [resolvable:$true] %s55_s9  ;;  %s22_s11 = int_to_ptr.vmem [resolvable:$true] %s21_s11 }
  0x11   :  { %s1707_s12 = scalar_lea.vmem %s56_s9, 8192  ;;  %p1712_p6 = scmp.lt.s32.totalorder %s56_s9, %s56_s9 }
  0x12   :  { %p1708_p5 = scmp.ne.s32.totalorder %s56_s9, %s1707_s12  ;;  %p1713_p7 = scmp.lt.s32.totalorder %s1707_s12, %s1707_s12 }
  0x14   :  { %p1714_p8 = por %p1713_p7, %p1712_p6 }
  0x16   :  { %p1715_p9 = pnand %p1714_p8, %p1708_p5 }
  0x18   :  { %1718 = shalt.err (!%p1715_p9)
}
  0x19   :  { %61 = dma.hbm_to_vmem [thread:$0]  %s1997_s3, 8192, %s56_s9, [#allocation9], %s1808_s27, %s1808_s27, %s1809_s28  }
  0x1a   :  { %s1727_s15 = scalar_lea.vmem %s22_s11, 256  ;;  %p1732_p11 = scmp.lt.s32.totalorder %s22_s11, %s22_s11 }
  0x1b   :  { %p1728_p10 = scmp.ne.s32.totalorder %s22_s11, %s1727_s15  ;;  %p1733_p12 = scmp.lt.s32.totalorder %s1727_s15, %s1727_s15 }
  0x1d   :  { %p1734_p13 = por %p1733_p12, %p1732_p11 }
  0x1f   :  { %p1735_p0 = pnand %p1734_p13, %p1728_p10 }
  0x21   :  { %1738 = shalt.err (!%p1735_p0)
}
  0x22   :  { %s1812_s1 = smov 128   ;;  %s1813_s16 = smov 8  }
  0x23   :  { %27 = dma.hbm_to_vmem [thread:$0]  %s1994_s0, 256, %s22_s11, [#allocation3], %s1812_s1, %s1812_s1, %s1813_s16  }
  0x24   :  { %s1814_s19 = smov [#allocation7]   ;;  %s1815_s3 = smov [#allocation10]  }
  0x25   :  { %s46_s20 = sshll.u32 %s1814_s19, 4  ;;  %s69_s21 = sshll.u32 %s1815_s3, 4  ;;  %s47_s20 = int_to_ptr.vmem [resolvable:$true] %s46_s20  ;;  %s70_s21 = int_to_ptr.vmem [resolvable:$true] %s69_s21 }
  0x26   :  { %s1747_s22 = scalar_lea.vmem %s47_s20, 64  ;;  %p1752_p2 = scmp.lt.s32.totalorder %s47_s20, %s47_s20 }
  0x27   :  { %p1748_p1 = scmp.ne.s32.totalorder %s47_s20, %s1747_s22  ;;  %p1753_p3 = scmp.lt.s32.totalorder %s1747_s22, %s1747_s22 }
  0x29   :  { %p1754_p4 = por %p1753_p3, %p1752_p2 }
  0x2b   :  { %p1755_p5 = pnand %p1754_p4, %p1748_p1 }
  0x2d   :  { %1758 = shalt.err (!%p1755_p5)
}
  0x2e   :  { %49 = dma.hbm_to_vmem [thread:$0]  %s1996_s2, 64, %s47_s20, [#allocation6]  }
  0x2f   :  { %s1767_s25 = scalar_lea.vmem %s70_s21, 2048  ;;  %p1772_p7 = scmp.lt.s32.totalorder %s70_s21, %s70_s21 }
  0x30   :  { %p1768_p6 = scmp.ne.s32.totalorder %s70_s21, %s1767_s25  ;;  %p1773_p8 = scmp.lt.s32.totalorder %s1767_s25, %s1767_s25 }
  0x32   :  { %p1774_p9 = por %p1773_p8, %p1772_p7 }
  0x34   :  { %p1775_p10 = pnand %p1774_p9, %p1768_p6 }
  0x36   :  { %1778 = shalt.err (!%p1775_p10)
}
  0x37   :  { %75 = dma.hbm_to_vmem [thread:$0]  %s1999_s5, 2048, %s70_s21, [#allocation9], %s1812_s1, %s1812_s1, %s1813_s16  }
  0x38   :  { %1799 = dma.done.wait [#allocation3], 256  }
  0x39   :  { %1800 = vsyncadd [#allocation3], 4294967040 }
  0x3a   :  { %1801 = dma.done.wait [#allocation6], 8256  }
  0x3b   :  { %1802 = vsyncadd [#allocation6], 4294959040 }
  0x3c   :  { %1803 = dma.done.wait [#allocation9], 10240  }
  0x3d   :  { %1804 = vsyncadd [#allocation9], 4294957056  ;;  %v1816_v0 = vmov 0.0   ;;  %v156_v1 = vld [vmem:[#allocation5 + $0x1e8] sm:$0xff]  ;;  %v158_v2 = vld [vmem:[#allocation5 + $0x1f8] sm:$0xff]  ;;  %vm1817_vm0 = vmmov 0  }
  0x3e   :  { %245 = vmatprep.mubr.f32.mxu0 %v1816_v0  ;;  %322 = vmatprep.mubr.f32.mxu1 %v1816_v0  ;;  %v155_v3 = vld [vmem:[#allocation5 + $0x1e0] sm:$0xff]  ;;  %v157_v4 = vld [vmem:[#allocation5 + $0x1f0] sm:$0xff]  ;;  %v152_v5 = vld [vmem:[#allocation5 + $0x1c8] sm:$0xff]  ;;  %vm736_vm1 = vcmask 64512  }
  0x3f   :  { %181 = vmatprep.subr.mxu0 %v156_v1  ;;  %258 = vmatprep.subr.mxu1 %v158_v2  ;;  %v154_v6 = vld [vmem:[#allocation5 + $0x1d8] sm:$0xff]  ;;  %v151_v7 = vld [vmem:[#allocation5 + $0x1c0] sm:$0xff]  ;;  %v153_v8 = vld [vmem:[#allocation5 + $0x1d0] sm:$0xff] }
  0x40   :  { %182 = vmatpush1.msra.mxu0 %v155_v3  ;;  %259 = vmatpush1.msra.mxu1 %v157_v4  ;;  %v148_v9 = vld [vmem:[#allocation5 + $0x1a8] sm:$0xff]  ;;  %v150_v10 = vld [vmem:[#allocation5 + $0x1b8] sm:$0xff]  ;;  %v147_v11 = vld [vmem:[#allocation5 + $0x1a0] sm:$0xff] }
  0x41   :  { %183 = vmatprep.subr.mxu0 %v152_v5  ;;  %260 = vmatprep.subr.mxu1 %v154_v6  ;;  %v149_v12 = vld [vmem:[#allocation5 + $0x1b0] sm:$0xff]  ;;  %v144_v13 = vld [vmem:[#allocation5 + $0x188] sm:$0xff]  ;;  %v146_v14 = vld [vmem:[#allocation5 + $0x198] sm:$0xff] }
  0x42   :  { %184 = vmatpush1.msra.mxu0 %v151_v7  ;;  %261 = vmatpush1.msra.mxu1 %v153_v8  ;;  %v143_v15 = vld [vmem:[#allocation5 + $0x180] sm:$0xff]  ;;  %v145_v16 = vld [vmem:[#allocation5 + $0x190] sm:$0xff]  ;;  %v140_v17 = vld [vmem:[#allocation5 + $0x168] sm:$0xff] }
  0x43   :  { %185 = vmatprep.subr.mxu0 %v148_v9  ;;  %262 = vmatprep.subr.mxu1 %v150_v10  ;;  %v142_v18 = vld [vmem:[#allocation5 + $0x178] sm:$0xff]  ;;  %v139_v19 = vld [vmem:[#allocation5 + $0x160] sm:$0xff]  ;;  %v141_v20 = vld [vmem:[#allocation5 + $0x170] sm:$0xff] }
  0x44   :  { %186 = vmatpush1.msra.mxu0 %v147_v11  ;;  %263 = vmatpush1.msra.mxu1 %v149_v12  ;;  %v136_v21 = vld [vmem:[#allocation5 + $0x148] sm:$0xff]  ;;  %v138_v22 = vld [vmem:[#allocation5 + $0x158] sm:$0xff]  ;;  %v135_v23 = vld [vmem:[#allocation5 + $0x140] sm:$0xff] }
  0x45   :  { %187 = vmatprep.subr.mxu0 %v144_v13  ;;  %264 = vmatprep.subr.mxu1 %v146_v14  ;;  %v137_v24 = vld [vmem:[#allocation5 + $0x150] sm:$0xff]  ;;  %v132_v25 = vld [vmem:[#allocation5 + $0x128] sm:$0xff]  ;;  %v134_v26 = vld [vmem:[#allocation5 + $0x138] sm:$0xff] }
  0x46   :  { %188 = vmatpush1.msra.mxu0 %v143_v15  ;;  %265 = vmatpush1.msra.mxu1 %v145_v16  ;;  %v131_v27 = vld [vmem:[#allocation5 + $0x120] sm:$0xff]  ;;  %v133_v28 = vld [vmem:[#allocation5 + $0x130] sm:$0xff]  ;;  %v128_v29 = vld [vmem:[#allocation5 + $0x108] sm:$0xff] }
  0x47   :  { %189 = vmatprep.subr.mxu0 %v140_v17  ;;  %266 = vmatprep.subr.mxu1 %v142_v18  ;;  %v130_v30 = vld [vmem:[#allocation5 + $0x118] sm:$0xff]  ;;  %v127_v31 = vld [vmem:[#allocation5 + $0x100] sm:$0xff]  ;;  %v129_v32 = vld [vmem:[#allocation5 + $0x110] sm:$0xff] }
  0x48   :  { %190 = vmatpush1.msra.mxu0 %v139_v19  ;;  %267 = vmatpush1.msra.mxu1 %v141_v20  ;;  %v124_v33 = vld [vmem:[#allocation5 + $0xe8] sm:$0xff]  ;;  %v126_v34 = vld [vmem:[#allocation5 + $0xf8] sm:$0xff]  ;;  %v123_v35 = vld [vmem:[#allocation5 + $0xe0] sm:$0xff] }
  0x49   :  { %191 = vmatprep.subr.mxu0 %v136_v21  ;;  %268 = vmatprep.subr.mxu1 %v138_v22  ;;  %v125_v36 = vld [vmem:[#allocation5 + $0xf0] sm:$0xff]  ;;  %v120_v37 = vld [vmem:[#allocation5 + $0xc8] sm:$0xff]  ;;  %v122_v38 = vld [vmem:[#allocation5 + $0xd8] sm:$0xff] }
  0x4a   :  { %192 = vmatpush1.msra.mxu0 %v135_v23  ;;  %269 = vmatpush1.msra.mxu1 %v137_v24  ;;  %v119_v39 = vld [vmem:[#allocation5 + $0xc0] sm:$0xff]  ;;  %v121_v40 = vld [vmem:[#allocation5 + $0xd0] sm:$0xff]  ;;  %v116_v41 = vld [vmem:[#allocation5 + $0xa8] sm:$0xff] }
  0x4b   :  { %193 = vmatprep.subr.mxu0 %v132_v25  ;;  %270 = vmatprep.subr.mxu1 %v134_v26  ;;  %v118_v42 = vld [vmem:[#allocation5 + $0xb8] sm:$0xff]  ;;  %v115_v43 = vld [vmem:[#allocation5 + $0xa0] sm:$0xff]  ;;  %v117_v44 = vld [vmem:[#allocation5 + $0xb0] sm:$0xff] }
  0x4c   :  { %194 = vmatpush1.msra.mxu0 %v131_v27  ;;  %271 = vmatpush1.msra.mxu1 %v133_v28  ;;  %v112_v45 = vld [vmem:[#allocation5 + $0x88] sm:$0xff]  ;;  %v114_v46 = vld [vmem:[#allocation5 + $0x98] sm:$0xff]  ;;  %v111_v47 = vld [vmem:[#allocation5 + $0x80] sm:$0xff] }
  0x4d   :  { %195 = vmatprep.subr.mxu0 %v128_v29  ;;  %272 = vmatprep.subr.mxu1 %v130_v30  ;;  %v113_v48 = vld [vmem:[#allocation5 + $0x90] sm:$0xff]  ;;  %v108_v49 = vld [vmem:[#allocation5 + $0x68] sm:$0xff]  ;;  %v110_v50 = vld [vmem:[#allocation5 + $0x78] sm:$0xff] }
  0x4e   :  { %196 = vmatpush1.msra.mxu0 %v127_v31  ;;  %273 = vmatpush1.msra.mxu1 %v129_v32  ;;  %v107_v51 = vld [vmem:[#allocation5 + $0x60] sm:$0xff]  ;;  %v109_v52 = vld [vmem:[#allocation5 + $0x70] sm:$0xff]  ;;  %v104_v53 = vld [vmem:[#allocation5 + $0x48] sm:$0xff] }
  0x4f   :  { %197 = vmatprep.subr.mxu0 %v124_v33  ;;  %274 = vmatprep.subr.mxu1 %v126_v34  ;;  %v106_v54 = vld [vmem:[#allocation5 + $0x58] sm:$0xff]  ;;  %v103_v55 = vld [vmem:[#allocation5 + $0x40] sm:$0xff]  ;;  %v105_v56 = vld [vmem:[#allocation5 + $0x50] sm:$0xff] }
  0x50   :  { %198 = vmatpush1.msra.mxu0 %v123_v35  ;;  %275 = vmatpush1.msra.mxu1 %v125_v36  ;;  %v100_v57 = vld [vmem:[#allocation5 + $0x28] sm:$0xff]  ;;  %v102_v58 = vld [vmem:[#allocation5 + $0x38] sm:$0xff]  ;;  %v99_v59 = vld [vmem:[#allocation5 + $0x20] sm:$0xff] }
  0x51   :  { %199 = vmatprep.subr.mxu0 %v120_v37  ;;  %276 = vmatprep.subr.mxu1 %v122_v38  ;;  %v101_v60 = vld [vmem:[#allocation5 + $0x30] sm:$0xff]  ;;  %v96_v61 = vld [vmem:[#allocation5 + $0x8] sm:$0xff]  ;;  %v98_v62 = vld [vmem:[#allocation5 + $0x18] sm:$0xff] }
  0x52   :  { %200 = vmatpush1.msra.mxu0 %v119_v39  ;;  %277 = vmatpush1.msra.mxu1 %v121_v40  ;;  %v95_v63 = vld [vmem:[#allocation5] sm:$0xff]  ;;  %v97_v1 = vld [vmem:[#allocation5 + $0x10] sm:$0xff] }
  0x53   :  { %201 = vmatprep.subr.mxu0 %v116_v41  ;;  %278 = vmatprep.subr.mxu1 %v118_v42  ;;  %v1882_v2 = vld [vmem:[#allocation2] sm:$0xff]  ;;  %v398_v4 = vld [vmem:[#allocation8 + $0x1f8] sm:$0xff]  ;;  %v395_v5 = vld [vmem:[#allocation8 + $0x1e0] sm:$0xff] }
  0x54   :  { %202 = vmatpush1.msra.mxu0 %v115_v43  ;;  %279 = vmatpush1.msra.mxu1 %v117_v44  ;;  %v396_v3 = vld [vmem:[#allocation8 + $0x1e8] sm:$0xff]  ;;  %v397_v6 = vld [vmem:[#allocation8 + $0x1f0] sm:$0xff]  ;;  %v394_v8 = vld [vmem:[#allocation8 + $0x1d8] sm:$0xff] }
  0x55   :  { %203 = vmatprep.subr.mxu0 %v112_v45  ;;  %280 = vmatprep.subr.mxu1 %v114_v46  ;;  %v392_v7 = vld [vmem:[#allocation8 + $0x1c8] sm:$0xff]  ;;  %v391_v9 = vld [vmem:[#allocation8 + $0x1c0] sm:$0xff]  ;;  %v393_v10 = vld [vmem:[#allocation8 + $0x1d0] sm:$0xff] }
  0x56   :  { %204 = vmatpush1.msra.mxu0 %v111_v47  ;;  %281 = vmatpush1.msra.mxu1 %v113_v48  ;;  %v388_v11 = vld [vmem:[#allocation8 + $0x1a8] sm:$0xff]  ;;  %v390_v12 = vld [vmem:[#allocation8 + $0x1b8] sm:$0xff]  ;;  %v387_v13 = vld [vmem:[#allocation8 + $0x1a0] sm:$0xff] }
  0x57   :  { %205 = vmatprep.subr.mxu0 %v108_v49  ;;  %282 = vmatprep.subr.mxu1 %v110_v50  ;;  %v389_v14 = vld [vmem:[#allocation8 + $0x1b0] sm:$0xff]  ;;  %v384_v15 = vld [vmem:[#allocation8 + $0x188] sm:$0xff]  ;;  %v386_v16 = vld [vmem:[#allocation8 + $0x198] sm:$0xff] }
  0x58   :  { %206 = vmatpush1.msra.mxu0 %v107_v51  ;;  %283 = vmatpush1.msra.mxu1 %v109_v52  ;;  %v383_v17 = vld [vmem:[#allocation8 + $0x180] sm:$0xff]  ;;  %v385_v18 = vld [vmem:[#allocation8 + $0x190] sm:$0xff]  ;;  %v380_v19 = vld [vmem:[#allocation8 + $0x168] sm:$0xff] }
  0x59   :  { %207 = vmatprep.subr.mxu0 %v104_v53  ;;  %284 = vmatprep.subr.mxu1 %v106_v54  ;;  %v382_v20 = vld [vmem:[#allocation8 + $0x178] sm:$0xff]  ;;  %v379_v21 = vld [vmem:[#allocation8 + $0x160] sm:$0xff]  ;;  %v381_v22 = vld [vmem:[#allocation8 + $0x170] sm:$0xff] }
  0x5a   :  { %208 = vmatpush1.msra.mxu0 %v103_v55  ;;  %285 = vmatpush1.msra.mxu1 %v105_v56  ;;  %v376_v23 = vld [vmem:[#allocation8 + $0x148] sm:$0xff]  ;;  %v378_v24 = vld [vmem:[#allocation8 + $0x158] sm:$0xff]  ;;  %v375_v25 = vld [vmem:[#allocation8 + $0x140] sm:$0xff] }
  0x5b   :  { %209 = vmatprep.subr.mxu0 %v100_v57  ;;  %286 = vmatprep.subr.mxu1 %v102_v58  ;;  %v377_v26 = vld [vmem:[#allocation8 + $0x150] sm:$0xff]  ;;  %v372_v27 = vld [vmem:[#allocation8 + $0x128] sm:$0xff]  ;;  %v374_v28 = vld [vmem:[#allocation8 + $0x138] sm:$0xff] }
  0x5c   :  { %210 = vmatpush1.msra.mxu0 %v99_v59  ;;  %287 = vmatpush1.msra.mxu1 %v101_v60  ;;  %v371_v29 = vld [vmem:[#allocation8 + $0x120] sm:$0xff]  ;;  %v373_v30 = vld [vmem:[#allocation8 + $0x130] sm:$0xff]  ;;  %v368_v31 = vld [vmem:[#allocation8 + $0x108] sm:$0xff] }
  0x5d   :  { %211 = vmatprep.subr.mxu0 %v96_v61  ;;  %288 = vmatprep.subr.mxu1 %v98_v62  ;;  %v370_v32 = vld [vmem:[#allocation8 + $0x118] sm:$0xff]  ;;  %v367_v33 = vld [vmem:[#allocation8 + $0x100] sm:$0xff]  ;;  %v369_v34 = vld [vmem:[#allocation8 + $0x110] sm:$0xff] }
  0x5e   :  { %212 = vmatpush1.msra.mxu0 %v95_v63  ;;  %289 = vmatpush1.msra.mxu1 %v97_v1  ;;  %v364_v35 = vld [vmem:[#allocation8 + $0xe8] sm:$0xff]  ;;  %v366_v36 = vld [vmem:[#allocation8 + $0xf8] sm:$0xff]  ;;  %v363_v37 = vld [vmem:[#allocation8 + $0xe0] sm:$0xff] }
  0x5f   :  { %246 = vmatmul.mubr.f32.vlgmr.msra.gmra.mxu0 %v1882_v2  ;;  %421 = vmatprep.subr.mxu0 %v396_v3  ;;  %v365_v38 = vld [vmem:[#allocation8 + $0xf0] sm:$0xff]  ;;  %v360_v39 = vld [vmem:[#allocation8 + $0xc8] sm:$0xff]  ;;  %v362_v40 = vld [vmem:[#allocation8 + $0xd8] sm:$0xff] }
  0x60   :  { %498 = vmatprep.subr.mxu1 %v398_v4  ;;  %323 = vmatmul.mubr.f32.vlgmr.msra.gmra.mxu1 %v1882_v2  ;;  %v359_v41 = vld [vmem:[#allocation8 + $0xc0] sm:$0xff]  ;;  %v361_v42 = vld [vmem:[#allocation8 + $0xd0] sm:$0xff]  ;;  %v356_v43 = vld [vmem:[#allocation8 + $0xa8] sm:$0xff] }
  0x61   :  { %422 = vmatpush1.msra.mxu0 %v395_v5  ;;  %499 = vmatpush1.msra.mxu1 %v397_v6  ;;  %v358_v44 = vld [vmem:[#allocation8 + $0xb8] sm:$0xff]  ;;  %v355_v45 = vld [vmem:[#allocation8 + $0xa0] sm:$0xff]  ;;  %v357_v46 = vld [vmem:[#allocation8 + $0xb0] sm:$0xff] }
  0x62   :  { %423 = vmatprep.subr.mxu0 %v392_v7  ;;  %500 = vmatprep.subr.mxu1 %v394_v8  ;;  %v352_v47 = vld [vmem:[#allocation8 + $0x88] sm:$0xff]  ;;  %v354_v48 = vld [vmem:[#allocation8 + $0x98] sm:$0xff]  ;;  %v351_v49 = vld [vmem:[#allocation8 + $0x80] sm:$0xff] }
  0x63   :  { %424 = vmatpush1.msra.mxu0 %v391_v9  ;;  %501 = vmatpush1.msra.mxu1 %v393_v10  ;;  %v353_v50 = vld [vmem:[#allocation8 + $0x90] sm:$0xff]  ;;  %v348_v51 = vld [vmem:[#allocation8 + $0x68] sm:$0xff]  ;;  %v350_v52 = vld [vmem:[#allocation8 + $0x78] sm:$0xff] }
  0x64   :  { %425 = vmatprep.subr.mxu0 %v388_v11  ;;  %502 = vmatprep.subr.mxu1 %v390_v12  ;;  %v347_v53 = vld [vmem:[#allocation8 + $0x60] sm:$0xff]  ;;  %v349_v54 = vld [vmem:[#allocation8 + $0x70] sm:$0xff]  ;;  %v344_v56 = vld [vmem:[#allocation8 + $0x48] sm:$0xff] }
  0x65   :  { %426 = vmatpush1.msra.mxu0 %v387_v13  ;;  %503 = vmatpush1.msra.mxu1 %v389_v14  ;;  %v1886_v55 = vld [vmem:[#allocation2 + $0x8] sm:$0xff]  ;;  %v343_v58 = vld [vmem:[#allocation8 + $0x40] sm:$0xff]  ;;  %v340_v60 = vld [vmem:[#allocation8 + $0x28] sm:$0xff] }
  0x66   :  { %427 = vmatprep.subr.mxu0 %v384_v15  ;;  %504 = vmatprep.subr.mxu1 %v386_v16  ;;  %v346_v57 = vld [vmem:[#allocation8 + $0x58] sm:$0xff]  ;;  %v345_v59 = vld [vmem:[#allocation8 + $0x50] sm:$0xff]  ;;  %v339_v62 = vld [vmem:[#allocation8 + $0x20] sm:$0xff] }
  0x67   :  { %428 = vmatpush1.msra.mxu0 %v383_v17  ;;  %505 = vmatpush1.msra.mxu1 %v385_v18  ;;  %v342_v61 = vld [vmem:[#allocation8 + $0x38] sm:$0xff]  ;;  %v341_v63 = vld [vmem:[#allocation8 + $0x30] sm:$0xff]  ;;  %v336_v1 = vld [vmem:[#allocation8 + $0x8] sm:$0xff] }
  0x68   :  { %429 = vmatprep.subr.mxu0 %v380_v19  ;;  %506 = vmatprep.subr.mxu1 %v382_v20  ;;  %v338_v3 = vld [vmem:[#allocation8 + $0x18] sm:$0xff]  ;;  %v335_v4 = vld [vmem:[#allocation8] sm:$0xff]  ;;  %v337_v5 = vld [vmem:[#allocation8 + $0x10] sm:$0xff] }
  0x69   :  { %430 = vmatpush1.msra.mxu0 %v379_v21  ;;  %507 = vmatpush1.msra.mxu1 %v381_v22  ;;  %v590_v6 = vld [vmem:[#allocation10 + $0x78] sm:$0xff]  ;;  %v589_v7 = vld [vmem:[#allocation10 + $0x70] sm:$0xff]  ;;  %v588_v8 = vld [vmem:[#allocation10 + $0x68] sm:$0xff]  ;;  %v161_v22 = vlaneseq }
  0x6a   :  { %431 = vmatprep.subr.mxu0 %v376_v23  ;;  %508 = vmatprep.subr.mxu1 %v378_v24  ;;  %v587_v9 = vld [vmem:[#allocation10 + $0x60] sm:$0xff]  ;;  %v586_v10 = vld [vmem:[#allocation10 + $0x58] sm:$0xff]  ;;  %v585_v11 = vld [vmem:[#allocation10 + $0x50] sm:$0xff] }
  0x6b   :  { %432 = vmatpush1.msra.mxu0 %v375_v25  ;;  %509 = vmatpush1.msra.mxu1 %v377_v26  ;;  %v584_v12 = vld [vmem:[#allocation10 + $0x48] sm:$0xff]  ;;  %v583_v13 = vld [vmem:[#allocation10 + $0x40] sm:$0xff]  ;;  %v582_v14 = vld [vmem:[#allocation10 + $0x38] sm:$0xff]  ;;  %v162_v23 = vshrl.u32 %v161_v22, 7 }
  0x6c   :  { %433 = vmatprep.subr.mxu0 %v372_v27  ;;  %510 = vmatprep.subr.mxu1 %v374_v28  ;;  %v581_v15 = vld [vmem:[#allocation10 + $0x30] sm:$0xff]  ;;  %v580_v16 = vld [vmem:[#allocation10 + $0x28] sm:$0xff]  ;;  %v579_v17 = vld [vmem:[#allocation10 + $0x20] sm:$0xff] }
  0x6d   :  { %434 = vmatpush1.msra.mxu0 %v371_v29  ;;  %511 = vmatpush1.msra.mxu1 %v373_v30  ;;  %v578_v18 = vld [vmem:[#allocation10 + $0x18] sm:$0xff]  ;;  %v577_v19 = vld [vmem:[#allocation10 + $0x10] sm:$0xff]  ;;  %v576_v20 = vld [vmem:[#allocation10 + $0x8] sm:$0xff]  ;;  %v163_v25 = vsub.s32 0, %v162_v23  ;;  %v167_v27 = vsub.s32 1, %v162_v23 }
  0x6e   :  { %435 = vmatprep.subr.mxu0 %v368_v31  ;;  %512 = vmatprep.subr.mxu1 %v370_v32  ;;  %v575_v21 = vld [vmem:[#allocation10] sm:$0xff]  ;;  %v159_v26 = vld [vmem:[#allocation7] sm:$0xf] }
  0x6f   :  { %436 = vmatpush1.msra.mxu0 %v367_v33  ;;  %513 = vmatpush1.msra.mxu1 %v369_v34  ;;  %v164_v30 = vrot.slane %v159_v26, %v163_v25  ;;  %v168_v32 = vrot.slane %v159_v26, %v167_v27  ;;  %v175_v33 = vsub.s32 3, %v162_v23 }
  0x70   :  { %437 = vmatprep.subr.mxu0 %v364_v35  ;;  %514 = vmatprep.subr.mxu1 %v366_v36 }
  0x71   :  { %438 = vmatpush1.msra.mxu0 %v363_v37  ;;  %515 = vmatpush1.msra.mxu1 %v365_v38  ;;  %v399_v38 = vld [vmem:[%s1998_s4] sm:$0xf] }
  0x72   :  { %439 = vmatprep.subr.mxu0 %v360_v39  ;;  %516 = vmatprep.subr.mxu1 %v362_v40  ;;  %v176_v40 = vrot.slane %v159_v26, %v175_v33 }
  0x73   :  { %440 = vmatpush1.msra.mxu0 %v359_v41  ;;  %517 = vmatpush1.msra.mxu1 %v361_v42  ;;  %v404_v42 = vrot.slane %v399_v38, %v163_v25 }
  0x74   :  { %441 = vmatprep.subr.mxu0 %v356_v43  ;;  %518 = vmatprep.subr.mxu1 %v358_v44  ;;  %v171_v44 = vsub.s32 2, %v162_v23 }
  0x75   :  { %442 = vmatpush1.msra.mxu0 %v355_v45  ;;  %519 = vmatpush1.msra.mxu1 %v357_v46 }
  0x76   :  { %443 = vmatprep.subr.mxu0 %v352_v47  ;;  %520 = vmatprep.subr.mxu1 %v354_v48  ;;  %v412_v48 = vrot.slane %v399_v38, %v171_v44 }
  0x77   :  { %444 = vmatpush1.msra.mxu0 %v351_v49  ;;  %521 = vmatpush1.msra.mxu1 %v353_v50  ;;  %v408_v49 = vrot.slane %v399_v38, %v167_v27 }
  0x78   :  { %445 = vmatprep.subr.mxu0 %v348_v51  ;;  %522 = vmatprep.subr.mxu1 %v350_v52 }
  0x79   :  { %251 = vmatprep.mubr.f32.mxu0 %v1816_v0  ;;  %446 = vmatpush1.msra.mxu0 %v347_v53 }
  0x7a   :  { %523 = vmatpush1.msra.mxu1 %v349_v54  ;;  %252 = vmatmul.mubr.f32.gmra.mxu0 %v1886_v55 }
  0x7b   :  { %447 = vmatprep.subr.mxu0 %v344_v56  ;;  %524 = vmatprep.subr.mxu1 %v346_v57 }
  0x7c   :  { %328 = vmatprep.mubr.f32.mxu1 %v1816_v0  ;;  %448 = vmatpush1.msra.mxu0 %v343_v58 }
  0x7d   :  { %525 = vmatpush1.msra.mxu1 %v345_v59  ;;  %449 = vmatprep.subr.mxu0 %v340_v60  ;;  %v172_v59 = vrot.slane %v159_v26, %v171_v44 }
  0x7e   :  { %329 = vmatmul.mubr.f32.gmra.mxu1 %v1886_v55  ;;  %526 = vmatprep.subr.mxu1 %v342_v61 }
  0x7f   :  { %450 = vmatpush1.msra.mxu0 %v339_v62  ;;  %527 = vmatpush1.msra.mxu1 %v341_v63 }
  0x80   :  { %451 = vmatprep.subr.mxu0 %v336_v1  ;;  %528 = vmatprep.subr.mxu1 %v338_v3  ;;  %v1925_v3 = vrot.slane %v399_v38, %v175_v33 }
  0x81   :  { %452 = vmatpush1.msra.mxu0 %v335_v4  ;;  %485 = vmatprep.mubr.f32.mxu0 %v1816_v0 }
  0x82   :  { %529 = vmatpush1.msra.mxu1 %v337_v5  ;;  %562 = vmatprep.mubr.f32.mxu1 %v1816_v0 }
  0x83   :  { %486 = vmatmul.mubr.f32.vlgmr.msra.gmra.mxu0 %v1882_v2  ;;  %563 = vmatmul.mubr.f32.vlgmr.msra.gmra.mxu1 %v1882_v2 }
  0x84   :  { %568 = vmatprep.mubr.f32.mxu1 %v1816_v0  ;;  %491 = vmatprep.mubr.f32.mxu0 %v1816_v0 }
  0x85   :  { %1585 = vmatprep.subr.mxu1 %v1816_v0  ;;  %1550 = vmatprep.subr.mxu0 %v590_v6 }
  0x86   :  { %1551 = vmatpush3.msra.mxu0 %v590_v6 }
  0x87   :  { %569 = vmatmul.mubr.f32.gmra.mxu1 %v1886_v55  ;;  %492 = vmatmul.mubr.f32.gmra.mxu0 %v1886_v55 }
  0x88   :  { %1582 = vmatprep.mubr.f32.mxu0 %v1882_v2  ;;  %1552 = vmatprep.subr.mxu0 %v589_v7 }
  0x89   :  { %1553 = vmatpush3.msra.mxu0 %v589_v7  ;;  %1587 = vmatprep.mubr.msk.f32.mxu1 %vm1817_vm0, %v1816_v0 }
  0x8a   :  { %1554 = vmatprep.subr.mxu0 %v588_v8 }
  0x8b   :  { %1555 = vmatpush3.msra.mxu0 %v588_v8 }
  0x8c   :  { %1556 = vmatprep.subr.mxu0 %v587_v9 }
  0x8d   :  { %1557 = vmatpush3.msra.mxu0 %v587_v9 }
  0x8e   :  { %1558 = vmatprep.subr.mxu0 %v586_v10 }
  0x8f   :  { %1559 = vmatpush3.msra.mxu0 %v586_v10 }
  0x90   :  { %1560 = vmatprep.subr.mxu0 %v585_v11 }
  0x91   :  { %1561 = vmatpush3.msra.mxu0 %v585_v11 }
  0x92   :  { %1562 = vmatprep.subr.mxu0 %v584_v12 }
  0x93   :  { %1563 = vmatpush3.msra.mxu0 %v584_v12 }
  0x94   :  { %1564 = vmatprep.subr.mxu0 %v583_v13 }
  0x95   :  { %1565 = vmatpush3.msra.mxu0 %v583_v13 }
  0x96   :  { %1566 = vmatprep.subr.mxu0 %v582_v14 }
  0x97   :  { %1567 = vmatpush3.msra.mxu0 %v582_v14 }
  0x98   :  { %1568 = vmatprep.subr.mxu0 %v581_v15 }
  0x99   :  { %1569 = vmatpush3.msra.mxu0 %v581_v15 }
  0x9a   :  { %1570 = vmatprep.subr.mxu0 %v580_v16 }
  0x9b   :  { %1571 = vmatpush3.msra.mxu0 %v580_v16 }
  0x9c   :  { %1572 = vmatprep.subr.mxu0 %v579_v17 }
  0x9d   :  { %1573 = vmatpush3.msra.mxu0 %v579_v17 }
  0x9e   :  { %1574 = vmatprep.subr.mxu0 %v578_v18 }
  0x9f   :  { %1575 = vmatpush3.msra.mxu0 %v578_v18 }
  0xa0   :  { %1576 = vmatprep.subr.mxu0 %v577_v19 }
  0xa1   :  { %1577 = vmatpush3.msra.mxu0 %v577_v19 }
  0xa2   :  { %1578 = vmatprep.subr.mxu0 %v576_v20 }
  0xa3   :  { %1579 = vmatpush3.msra.mxu0 %v576_v20 }
  0xa4   :  { %1580 = vmatprep.subr.mxu0 %v575_v21 }
  0xa5   :  { %1581 = vmatpush3.msra.mxu0 %v575_v21 }
  0xa6   :  { %1583 = vmatmul.mubr.f32.vlgmr.msra.gmra.mxu0 %v1886_v55  ;;  %1620 = vmatprep.subr.mxu0 %v1816_v0 }
  0xa7   :  { %1622 = vmatprep.mubr.msk.f32.mxu0 %vm1817_vm0, %v1816_v0 }
 0x11f   :  { %v247_v24 = vpop.f32.mrf.mxu0 }
 0x120   :  { %v324_v29 = vpop.f32.mrf.mxu1  ;;  %v248_v52 = vadd.f32 %v247_v24, %v164_v30 }
 0x121   :  { %v249_v28 = vpop.f32.mrf.mxu0  ;;  %v325_v4 = vadd.f32 %v324_v29, %v172_v59 }
 0x122   :  { %v326_v35 = vpop.f32.mrf.mxu1  ;;  %v250_v63 = vadd.f32 %v249_v28, %v168_v32 }
 0x123   :  { %v327_v6 = vadd.f32 %v326_v35, %v176_v40 }
 0x13a   :  { %v253_v31 = vpop.f32.mrf.mxu0 }
 0x13b   :  { %v1908_v34 = vadd.f32 %v253_v31, %v164_v30 }
 0x13c   :  { %v255_v36 = vpop.f32.mrf.mxu0 }
 0x13d   :  { %v1910_v37 = vadd.f32 %v255_v36, %v168_v32 }
 0x13e   :  { %v330_v39 = vpop.f32.mrf.mxu1 }
 0x13f   :  { %v331_v1 = vadd.f32 %v330_v39, %v172_v59 }
 0x140   :  { %v332_v41 = vpop.f32.mrf.mxu1 }
 0x141   :  { %v1915_v43 = vadd.f32 %v332_v41, %v176_v40 }
 0x143   :  { %v487_v45 = vpop.f32.mrf.mxu0  ;;  %v564_v46 = vpop.f32.mrf.mxu1 }
 0x144   :  { %v488_v47 = vadd.f32 %v487_v45, %v404_v42  ;;  %v565_v61 = vadd.f32 %v564_v46, %v412_v48 }
 0x145   :  { %v489_v50 = vpop.f32.mrf.mxu0  ;;  %v566_v51 = vpop.f32.mrf.mxu1 }
 0x146   :  { %1586 = vmatpush3.xpose.msra.mxu1 %v488_v47  ;;  %v490_v56 = vadd.f32 %v489_v50, %v408_v49  ;;  %v567_v5 = vadd.f32 %v566_v51, %v1925_v3 }
 0x147   :  { %v570_v53 = vpop.f32.mrf.mxu1  ;;  %1590 = vmatprep.subr.mxu1 %v1816_v0  ;;  %v493_v54 = vpop.f32.mrf.mxu0 }
 0x148   :  { %v571_v57 = vadd.f32 %v570_v53, %v412_v48  ;;  %v1918_v58 = vadd.f32 %v493_v54, %v404_v42 }
 0x149   :  { %1588 = vmatmul.mubr.f32.vlgmr.msra.gmra.mxu1 %v248_v52  ;;  %v495_v60 = vpop.f32.mrf.mxu0  ;;  %v1940_v9 = vpop.f32.mrf.mxu1 }
 0x14a   :  { %1591 = vmatpush3.xpose.msra.mxu1 %v490_v56  ;;  %1621 = vmatpush3.xpose.msra.mxu0 %v571_v57  ;;  %v1920_v62 = vadd.f32 %v495_v60, %v408_v49 }
 0x14b   :  { %1592 = vmatprep.mubr.msk.f32.mxu1 %vm1817_vm0, %v1816_v0  ;;  %1595 = vmatprep.subr.mxu1 %v1816_v0 }
 0x14c   :  { %1630 = vmatprep.subr.mxu0 %v1816_v0 }
 0x14d   :  { %1593 = vmatmul.mubr.f32.vlgmr.msra.gmra.mxu1 %v250_v63  ;;  %1623 = vmatmul.mubr.f32.vlgmr.msra.gmra.mxu0 %v331_v1 }
 0x14e   :  { %1596 = vmatpush3.xpose.msra.mxu1 %v565_v61  ;;  %1597 = vmatprep.mubr.msk.f32.mxu1 %vm1817_vm0, %v1816_v0 }
 0x14f   :  { %1600 = vmatprep.subr.mxu1 %v1816_v0  ;;  %1632 = vmatprep.mubr.msk.f32.mxu0 %vm1817_vm0, %v1816_v0 }
 0x151   :  { %1598 = vmatmul.mubr.f32.vlgmr.msra.gmra.mxu1 %v325_v4  ;;  %v573_v4 = vadd.f32 %v1940_v9, %v1925_v3 }
 0x152   :  { %1601 = vmatpush3.xpose.msra.mxu1 %v567_v5  ;;  %1602 = vmatprep.mubr.msk.f32.mxu1 %vm1817_vm0, %v1816_v0 }
 0x153   :  { %1605 = vmatprep.subr.mxu1 %v1816_v0 }
 0x155   :  { %1603 = vmatmul.mubr.f32.vlgmr.msra.gmra.mxu1 %v327_v6 }
 0x156   :  { %1607 = vmatprep.mubr.msk.f32.mxu1 %vm1817_vm0, %v1816_v0 }
 0x166   :  { %v1584_v7 = vpop.f32.mrf.mxu0 }
 0x167   :  { %1631 = vmatpush3.msra.mxu0 %v1584_v7 }
 0x168   :  { %v657_v8 = vpop.f32.mrf.mxu0 }
 0x169   :  { %1606 = vmatpush3.msra.mxu1 %v657_v8 }
 0x16a   :  { %1610 = vmatprep.subr.mxu1 %v1816_v0 }
 0x209   :  { %v732_v10 = vpop.f32.mrf.mxu1 }
 0x20a   :  { %v737_v11 = vsel %vm736_vm1, %v732_v10, -inf }
 0x20b   :  { %738 = vmax.xlane.f32.xlu0 %v737_v11  ;;  %v1589_v12 = vpop.f32.mrf.mxu1 }
 0x20d   :  { %v815_v13 = vpop.f32.mrf.mxu1  ;;  %v1943_v14 = vpop.f32.mrf.mxu0 }
 0x20e   :  { %v819_v15 = vsel %vm736_vm1, %v815_v13, -inf }
 0x20f   :  { %v1624_v16 = vpop.f32.mrf.mxu0  ;;  %820 = vmax.xlane.f32.xlu0 %v819_v15  ;;  %v1594_v17 = vpop.f32.mrf.mxu1 }
 0x211   :  { %v897_v18 = vpop.f32.mrf.mxu1 }
 0x212   :  { %v901_v19 = vsel %vm736_vm1, %v897_v18, -inf }
 0x213   :  { %902 = vmax.xlane.f32.xlu1 %v901_v19  ;;  %v1599_v20 = vpop.f32.mrf.mxu1 }
 0x215   :  { %v979_v21 = vpop.f32.mrf.mxu1 }
 0x216   :  { %v983_v22 = vsel %vm736_vm1, %v979_v21, -inf }
 0x217   :  { %984 = vmax.xlane.f32.xlu1 %v983_v22  ;;  %v1604_v23 = vpop.f32.mrf.mxu1 }
 0x294   :  { %v739_v24 = vpop.xlane.xlu0 %738 }
 0x295   :  { %v740_v25 = vsub.f32 %v732_v10, %v739_v24 }
 0x297   :  { %v741_v26 = vmul.f32 1.442695, %v740_v25 }
 0x298   :  { %v821_v27 = vpop.xlane.xlu0 %820 }
 0x299   :  { %1647 = vpow2.f32 %v741_v26  ;;  %v822_v28 = vsub.f32 %v815_v13, %v821_v27 }
 0x29b   :  { %v823_v29 = vmul.f32 1.442695, %v822_v28 }
 0x29c   :  { %v903_v30 = vpop.xlane.xlu1 %902 }
 0x29d   :  { %1649 = vpow2.f32 %v823_v29  ;;  %v904_v31 = vsub.f32 %v897_v18, %v903_v30 }
 0x29f   :  { %v905_v32 = vmul.f32 1.442695, %v904_v31 }
 0x2a0   :  { %v985_v33 = vpop.xlane.xlu1 %984 }
 0x2a1   :  { %1651 = vpow2.f32 %v905_v32  ;;  %v986_v35 = vsub.f32 %v979_v21, %v985_v33 }
 0x2a3   :  { %v987_v36 = vmul.f32 1.442695, %v986_v35 }
 0x2a5   :  { %1653 = vpow2.f32 %v987_v36 }
 0x2a6   :  { %v1648_v38 = vpop.eup %1647 }
 0x2a7   :  { %v743_v39 = vsel %vm736_vm1, %v1648_v38, 0.0 }
 0x2a8   :  { %744 = vadd.xlane.f32.xlu0 %v743_v39 }
 0x2aa   :  { %v1650_v40 = vpop.eup %1649 }
 0x2ab   :  { %v825_v41 = vsel %vm736_vm1, %v1650_v40, 0.0 }
 0x2ac   :  { %826 = vadd.xlane.f32.xlu1 %v825_v41 }
 0x2ae   :  { %v1652_v42 = vpop.eup %1651 }
 0x2af   :  { %v907_v44 = vsel %vm736_vm1, %v1652_v42, 0.0 }
 0x2b0   :  { %908 = vadd.xlane.f32.xlu0 %v907_v44 }
 0x2b2   :  { %v1654_v45 = vpop.eup %1653 }
 0x2b3   :  { %v989_v46 = vsel %vm736_vm1, %v1654_v45, 0.0 }
 0x2b4   :  { %990 = vadd.xlane.f32.xlu1 %v989_v46 }
 0x331   :  { %v745_v47 = vpop.xlane.xlu0 %744 }
 0x335   :  { %v827_v48 = vpop.xlane.xlu1 %826 }
 0x336   :  { %1655 = vrcp.f32 %v827_v48 }
 0x337   :  { %1657 = vrcp.f32 %v745_v47 }
 0x339   :  { %v909_v49 = vpop.xlane.xlu0 %908 }
 0x33a   :  { %1659 = vrcp.f32 %v909_v49 }
 0x33d   :  { %v991_v50 = vpop.xlane.xlu1 %990 }
 0x33e   :  { %1661 = vrcp.f32 %v991_v50 }
 0x343   :  { %v1656_v51 = vpop.eup %1655 }
 0x344   :  { %v1658_v52 = vpop.eup %1657  ;;  %v829_v53 = vmul.f32 %v1656_v51, %v1650_v40 }
 0x345   :  { %v747_v56 = vmul.f32 %v1658_v52, %v1648_v38 }
 0x347   :  { %v1660_v54 = vpop.eup %1659  ;;  %v830_v59 = vadd.f32 %v829_v53, %v747_v56 }
 0x348   :  { %v911_v57 = vmul.f32 %v1660_v54, %v1652_v42 }
 0x34a   :  { %v912_v61 = vadd.f32 %v911_v57, %v830_v59 }
 0x34b   :  { %v1662_v60 = vpop.eup %1661 }
 0x34c   :  { %v993_v63 = vmul.f32 %v1662_v60, %v1654_v45 }
 0x34e   :  { %v994_v1 = vadd.f32 %v993_v63, %v912_v61 }
 0x350   :  { %1608 = vmatmul.mubr.msk.f32.vlgmr.msra.gmra.mxu1 %vm736_vm1, %v994_v1 }
 0x351   :  { %1611 = vmatpush3.xpose.msra.mxu1 %v1918_v58  ;;  %1612 = vmatprep.mubr.msk.f32.mxu1 %vm1817_vm0, %v1816_v0 }
 0x352   :  { %1615 = vmatprep.subr.mxu1 %v1816_v0 }
 0x354   :  { %1613 = vmatmul.mubr.f32.vlgmr.msra.gmra.mxu1 %v1908_v34  ;;  %v1971_v34 = vld [vmem:[%s2000_s6] ss:$0 sm:$0xff]  ;;  %s1818_s6 = smov [#allocation11]  }
 0x355   :  { %1616 = vmatpush3.xpose.msra.mxu1 %v1920_v62  ;;  %1617 = vmatprep.mubr.msk.f32.mxu1 %vm1817_vm0, %v1816_v0  ;;  %s1494_s28 = sshll.u32 %s1818_s6, 4  ;;  %s1495_s28 = int_to_ptr.vmem [resolvable:$true] %s1494_s28 }
 0x356   :  { %1625 = vmatprep.subr.mxu1 %v1816_v0  ;;  %s1779_s29 = scalar_lea.vmem %s1495_s28, 256  ;;  %p1784_p12 = scmp.lt.s32.totalorder %s1495_s28, %s1495_s28 }
 0x357   :  { %p1780_p11 = scmp.ne.s32.totalorder %s1495_s28, %s1779_s29  ;;  %p1785_p13 = scmp.lt.s32.totalorder %s1779_s29, %s1779_s29 }
 0x358   :  { %1618 = vmatmul.mubr.f32.vlgmr.msra.gmra.mxu1 %v1910_v37 }
 0x359   :  { %1626 = vmatpush3.xpose.msra.mxu1 %v573_v4  ;;  %1627 = vmatprep.mubr.msk.f32.mxu1 %vm1817_vm0, %v1816_v0  ;;  %p1786_p0 = por %p1785_p13, %p1784_p12 }
 0x35b   :  { %p1787_p1 = pnand %p1786_p0, %p1780_p11 }
 0x35c   :  { %1628 = vmatmul.mubr.f32.vlgmr.msra.gmra.mxu1 %v1915_v43  ;;  %v1312_v43 = vsel %vm736_vm1, %v1943_v14, -inf }
 0x410   :  { %v1071_v58 = vpop.f32.mrf.mxu1 }
 0x411   :  { %v1072_v62 = vadd.f32 %v1971_v34, %v1071_v58 }
 0x412   :  { %v1609_v5 = vpop.f32.mrf.mxu1 }
 0x413   :  { %v1075_v6 = vmax.f32 %v1072_v62, 0.0 }
 0x414   :  { %v1144_v7 = vpop.f32.mrf.mxu1 }
 0x415   :  { %v1076_v3 = vadd.f32 %v1075_v6, %v1882_v2  ;;  %v1148_v37 = vsel %vm736_vm1, %v1144_v7, -inf }
 0x416   :  { %1149 = vmax.xlane.f32.xlu0 %v1148_v37  ;;  %v1614_v8 = vpop.f32.mrf.mxu1 }
 0x417   :  { %1077 = vst [vmem:[#allocation11] sm:$0xff] %v1076_v3 }
 0x418   :  { %v1226_v0 = vpop.f32.mrf.mxu1 }
 0x419   :  { %v1230_v9 = vsel %vm736_vm1, %v1226_v0, -inf }
 0x41a   :  { %1313 = vmax.xlane.f32.xlu0 %v1312_v43  ;;  %1231 = vmax.xlane.f32.xlu1 %v1230_v9  ;;  %v1619_v10 = vpop.f32.mrf.mxu1 }
 0x41c   :  { %v1390_v11 = vpop.f32.mrf.mxu1 }
 0x41d   :  { %v1394_v12 = vsel %vm736_vm1, %v1390_v11, -inf }
 0x41e   :  { %1395 = vmax.xlane.f32.xlu1 %v1394_v12  ;;  %v1629_v13 = vpop.f32.mrf.mxu1 }
 0x49f   :  { %v1150_v2 = vpop.xlane.xlu0 %1149 }
 0x4a0   :  { %v1151_v15 = vsub.f32 %v1144_v7, %v1150_v2 }
 0x4a2   :  { %v1152_v16 = vmul.f32 1.442695, %v1151_v15 }
 0x4a3   :  { %v1314_v17 = vpop.xlane.xlu0 %1313  ;;  %v1232_v18 = vpop.xlane.xlu1 %1231 }
 0x4a4   :  { %1663 = vpow2.f32 %v1152_v16  ;;  %v1315_v19 = vsub.f32 %v1943_v14, %v1314_v17  ;;  %v1233_v20 = vsub.f32 %v1226_v0, %v1232_v18 }
 0x4a6   :  { %v1316_v21 = vmul.f32 1.442695, %v1315_v19  ;;  %v1234_v22 = vmul.f32 1.442695, %v1233_v20 }
 0x4a7   :  { %v1396_v23 = vpop.xlane.xlu1 %1395 }
 0x4a8   :  { %1665 = vpow2.f32 %v1316_v21  ;;  %v1397_v24 = vsub.f32 %v1390_v11, %v1396_v23 }
 0x4a9   :  { %1667 = vpow2.f32 %v1234_v22 }
 0x4aa   :  { %v1398_v25 = vmul.f32 1.442695, %v1397_v24 }
 0x4ac   :  { %1669 = vpow2.f32 %v1398_v25 }
 0x4b1   :  { %v1664_v26 = vpop.eup %1663 }
 0x4b2   :  { %v1154_v27 = vsel %vm736_vm1, %v1664_v26, 0.0 }
 0x4b3   :  { %1155 = vadd.xlane.f32.xlu0 %v1154_v27 }
 0x4b5   :  { %v1666_v28 = vpop.eup %1665 }
 0x4b6   :  { %v1668_v29 = vpop.eup %1667  ;;  %v1318_v30 = vsel %vm736_vm1, %v1666_v28, 0.0 }
 0x4b7   :  { %1319 = vadd.xlane.f32.xlu0 %v1318_v30  ;;  %v1236_v14 = vsel %vm736_vm1, %v1668_v29, 0.0 }
 0x4b8   :  { %1237 = vadd.xlane.f32.xlu1 %v1236_v14 }
 0x4b9   :  { %v1670_v31 = vpop.eup %1669 }
 0x4ba   :  { %v1400_v32 = vsel %vm736_vm1, %v1670_v31, 0.0 }
 0x4bc   :  { %1401 = vadd.xlane.f32.xlu1 %v1400_v32 }
 0x53c   :  { %v1156_v33 = vpop.xlane.xlu0 %1155 }
 0x53d   :  { %1671 = vrcp.f32 %v1156_v33 }
 0x540   :  { %v1320_v35 = vpop.xlane.xlu0 %1319 }
 0x541   :  { %1673 = vrcp.f32 %v1320_v35  ;;  %v1238_v36 = vpop.xlane.xlu1 %1237 }
 0x542   :  { %1675 = vrcp.f32 %v1238_v36 }
 0x545   :  { %v1402_v38 = vpop.xlane.xlu1 %1401 }
 0x546   :  { %1677 = vrcp.f32 %v1402_v38 }
 0x54a   :  { %v1672_v39 = vpop.eup %1671 }
 0x54b   :  { %v1158_v42 = vmul.f32 %v1672_v39, %v1664_v26 }
 0x54e   :  { %v1674_v40 = vpop.eup %1673 }
 0x54f   :  { %v1676_v41 = vpop.eup %1675  ;;  %v1322_v45 = vmul.f32 %v1674_v40, %v1666_v28 }
 0x550   :  { %v1240_v44 = vmul.f32 %v1676_v41, %v1668_v29 }
 0x552   :  { %v1241_v46 = vadd.f32 %v1240_v44, %v1158_v42 }
 0x553   :  { %v1678_v47 = vpop.eup %1677 }
 0x554   :  { %v1404_v48 = vmul.f32 %v1678_v47, %v1670_v31  ;;  %v1323_v49 = vadd.f32 %v1322_v45, %v1241_v46 }
 0x556   :  { %v1405_v50 = vadd.f32 %v1404_v48, %v1323_v49 }
 0x558   :  { %1633 = vmatmul.mubr.msk.f32.vlgmr.msra.gmra.mxu0 %vm736_vm1, %v1405_v50 }
 0x618   :  { %v1482_v51 = vpop.f32.mrf.mxu0 }
 0x619   :  { %v1483_v52 = vadd.f32 %v1971_v34, %v1482_v51 }
 0x61a   :  { %v1634_v53 = vpop.f32.mrf.mxu0 }
 0x61b   :  { %v1486_v54 = vmax.f32 %v1483_v52, 0.0 }
 0x61d   :  { %v1487_v56 = vadd.f32 %v1486_v54, %v1886_v55 }
 0x61f   :  { %1488 = vst [vmem:[#allocation11 + $0x8] sm:$0xff] %v1487_v56 }
 0x620   :  { %1790 = shalt.err (!%p1787_p1)
}
 0x621   :  { %1500 = dma.vmem_to_hbm [thread:$0]  %s1495_s28, 256, %s2001_s7, [#allocation4], %s1812_s1, %s1812_s1, %s1813_s16  }
 0x622   :  { %1805 = dma.done.wait [#allocation4], 256  }
 0x623   :  { %1806 = vsyncadd [#allocation4], 4294967040 }
 0x624   :  { %1504 = vsyncpa [#allocation3], 1 }
 0x625   :  { %1505 = vsyncpa [#allocation6], 1 }
 0x626   :  { %1506 = vsyncpa [#allocation9], 1 }
 0x627   :  { %1507 = vsyncpa [#allocation4], 1 }

</bundles_post_ra>
